<compile_context>
chip_gen: v5e
topology: v5e:2x2
jax: 0.10.0
libtpu: 0.0.40
codegen_flags: <defaults>
</compile_context>

<pallas_src>
import functools
import math

import jax
import jax.numpy as jnp
from jax import lax
from jax.experimental import pallas as pl
from jax.experimental.pallas import tpu as pltpu

_LANES = 128
_LOG2E = math.log2(math.e)


def _round_up(x, m):
    return ((x + m - 1) // m) * m


def _choose_tile(seq_len, target):
    """Largest tile <= target that is a multiple of 128 and divides seq_len,
    falling back to the full sequence length (small S)."""
    if seq_len <= target:
        return seq_len
    t = (target // _LANES) * _LANES
    while t >= _LANES:
        if seq_len % t == 0:
            return t
        t -= _LANES
    return seq_len


def _rep_lanes(x, n):
    """x is (rows, 128) lane-replicated; return a value broadcastable against
    (rows, n).  For n a multiple of 128 this is a cheap lane tile (no
    single-lane broadcast); for small n fall back to a (rows, 1) slice."""
    if n % _LANES == 0:
        reps = n // _LANES
        return x if reps == 1 else jnp.tile(x, (1, reps))
    return x[:, :1]


def _flash_attn_kernel(*refs, scale_log2e, causal, has_mask, kv_len,
                       block_q, block_kv):
    if has_mask:
        q_ref, k_ref, v_ref, mask_ref, o_ref, m_sc, l_sc, acc_sc = refs
    else:
        q_ref, k_ref, v_ref, o_ref, m_sc, l_sc, acc_sc = refs
        mask_ref = None

    qi = pl.program_id(2)
    ki = pl.program_id(3)
    nk = pl.num_programs(3)

    @pl.when(ki == 0)
    def _init():
        m_sc[...] = jnp.full(m_sc.shape, -jnp.inf, dtype=m_sc.dtype)
        l_sc[...] = jnp.zeros(l_sc.shape, dtype=l_sc.dtype)
        acc_sc[...] = jnp.zeros(acc_sc.shape, dtype=acc_sc.dtype)

    q_lo = qi * block_q
    kv_lo = ki * block_kv

    def _compute():
        # Fold scale * log2(e) into Q (tq*D mults instead of per-score work).
        q = q_ref[0, 0] * scale_log2e                         # (tq, D)
        k = k_ref[0, 0]                                       # (tkv, D)
        v = v_ref[0, 0]                                       # (tkv, D)

        # scores (log2 domain) = (Q * scale * log2e) K^T; contract last dims,
        # no K transpose.
        s = lax.dot_general(q, k, (((1,), (1,)), ((), ())),
                            preferred_element_type=jnp.float32)  # (tq, tkv)

        neg_inf = -jnp.inf
        if has_mask:
            s = jnp.where(mask_ref[0, 0] != 0, s, neg_inf)
        if causal or (kv_len is not None):
            k_pos = kv_lo + lax.broadcasted_iota(jnp.int32, s.shape, 1)
            if kv_len is not None:                    # padded tail keys
                s = jnp.where(k_pos < kv_len, s, neg_inf)
            if causal:
                q_pos = q_lo + lax.broadcasted_iota(jnp.int32, s.shape, 0)
                s = jnp.where(q_pos >= k_pos, s, neg_inf)

        m_prev = m_sc[...]                                    # (tq, 128)
        m_curr = jnp.max(s, axis=-1, keepdims=True)           # (tq, 1)
        m_next = jnp.maximum(m_prev, m_curr)                  # (tq, 128)
        # Guard (-inf) - (-inf) -> NaN for rows fully masked so far.
        m_safe = jnp.where(m_next == neg_inf, 0.0, m_next)
        alpha = jnp.exp2(m_prev - m_safe)                     # (tq, 128)
        p = jnp.exp2(s - _rep_lanes(m_safe, s.shape[-1]))     # (tq, tkv)

        l_sc[...] = alpha * l_sc[...] + jnp.sum(p, axis=-1, keepdims=True)
        acc_sc[...] = (_rep_lanes(alpha, acc_sc.shape[-1]) * acc_sc[...]
                       + jnp.dot(p.astype(v.dtype), v,
                                 preferred_element_type=jnp.float32))
        m_sc[...] = m_next

    if causal:
        # Skip compute for KV tiles entirely above the diagonal (their DMA is
        # also elided via the clamped K/V index_map in the wrapper).
        @pl.when(kv_lo < q_lo + block_q)
        def _run():
            _compute()
    else:
        _compute()

    @pl.when(ki == nk - 1)
    def _finalize():
        # Exact reciprocal: approx=True is not accurate enough for 2e-3 parity.
        inv_l = 1.0 / l_sc[...]
        o_ref[0, 0] = (acc_sc[...] * _rep_lanes(inv_l, acc_sc.shape[-1])
                       ).astype(o_ref.dtype)


def scaled_dot_product_attention(query, key, value,
                                 attention_mask=None,
                                 causal_mask=False,
                                 scale=None,
                                 block_q=512,
                                 block_kv=256):
    """Pallas TPU implementation of ScaledDotProductAttention.forward."""
    B, H, S, D = query.shape
    if scale is None:
        scale = 1.0 / math.sqrt(D)

    # Pad S up to a multiple of 128 when needed so tuned tiling always applies
    # (never one S-wide KV tile + SxS scores for large, odd S).
    if S > _LANES and S % _LANES != 0:
        S_pad = _round_up(S, _LANES)
    else:
        S_pad = S
    padded = S_pad != S
    if padded:
        pad_cfg = ((0, 0), (0, 0), (0, S_pad - S), (0, 0))
        query = jnp.pad(query, pad_cfg)
        key = jnp.pad(key, pad_cfg)
        value = jnp.pad(value, pad_cfg)

    tq = _choose_tile(S_pad, block_q)
    tkv = _choose_tile(S_pad, block_kv)
    nq, nk = S_pad // tq, S_pad // tkv

    q_spec = pl.BlockSpec((1, 1, tq, D), lambda b, h, qi, ki: (b, h, qi, 0))

    if causal_mask:
        # Clamp the KV block index to the last block this q tile needs, so the
        # skipped above-diagonal iterations repeat the previous block index and
        # Pallas elides the K/V DMA entirely.
        def kv_index(b, h, qi, ki):
            last = ((qi + 1) * tq - 1) // tkv
            return (b, h, jnp.minimum(ki, last), 0)
    else:
        def kv_index(b, h, qi, ki):
            return (b, h, ki, 0)
    kv_spec = pl.BlockSpec((1, 1, tkv, D), kv_index)

    in_specs = [q_spec, kv_spec, kv_spec]
    inputs = [query, key, value]

    has_mask = attention_mask is not None
    if has_mask:
        # Canonicalize to 4D in its NATURAL broadcast shape; keep it int8
        # (no dense f32 (B,H,S,S) bias is ever materialized or streamed).
        m = attention_mask
        if m.ndim == 2:            # (B, Sk)     -> (B, 1, 1, Sk)
            m = m[:, None, None, :]
        elif m.ndim == 3:          # (B, Sq, Sk) -> (B, 1, Sq, Sk)
            m = m[:, None, :, :]
        m = (m != 0)
        if padded:
            Bm, Hm, Qm, Km = m.shape
            m = jnp.pad(m, ((0, 0), (0, 0),
                            (0, S_pad - S if Qm == S else 0),
                            (0, S_pad - S if Km == S else 0)),
                        constant_values=True)   # padded keys masked in-kernel
        m = m.astype(jnp.int8)
        Bm, Hm, Qm, Km = m.shape
        blk = (1, 1, tq if Qm == S_pad else Qm, tkv if Km == S_pad else Km)

        def mask_index(b, h, qi, ki):
            return (b if Bm != 1 else 0,
                    h if Hm != 1 else 0,
                    qi if Qm == S_pad else 0,
                    ki if Km == S_pad else 0)

        in_specs.append(pl.BlockSpec(blk, mask_index))
        inputs.append(m)

    kernel = functools.partial(_flash_attn_kernel,
                               scale_log2e=float(scale) * _LOG2E,
                               causal=bool(causal_mask),
                               has_mask=has_mask,
                               kv_len=S if padded else None,
                               block_q=tq,
                               block_kv=tkv)

    out = pl.pallas_call(
        kernel,
        out_shape=jax.ShapeDtypeStruct((B, H, S_pad, D), query.dtype),
        grid_spec=pltpu.PrefetchScalarGridSpec(
            num_scalar_prefetch=0,
            grid=(B, H, nq, nk),
            in_specs=in_specs,
            out_specs=pl.BlockSpec((1, 1, tq, D),
                                   lambda b, h, qi, ki: (b, h, qi, 0)),
            scratch_shapes=[
                pltpu.VMEM((tq, _LANES), jnp.float32),  # running max (lane-rep)
                pltpu.VMEM((tq, _LANES), jnp.float32),  # running denom
                pltpu.VMEM((tq, D), jnp.float32),       # running acc
            ],
        ),
        compiler_params=pltpu.CompilerParams(
            dimension_semantics=("parallel", "parallel", "parallel",
                                 "arbitrary")),
    )(*inputs)

    if padded:
        out = out[:, :, :S, :]
    return out


def _reference(query, key, value, attention_mask=None, causal_mask=False,
               scale=None):
    B, H, S, D = query.shape
    if scale is None:
        scale = 1.0 / math.sqrt(D)
    scores = jnp.einsum("bhqd,bhkd->bhqk", query, key).astype(jnp.float32) * scale
    if causal_mask:
        tri = jnp.tril(jnp.ones((S, S), dtype=bool))
        scores = jnp.where(tri, scores, -jnp.inf)
    if attention_mask is not None:
        m = attention_mask
        if m.ndim == 2:
            m = m[:, None, None, :]
        elif m.ndim == 3:
            m = m[:, None, :, :]
        scores = jnp.where(m == 0, -jnp.inf, scores)
    w = jax.nn.softmax(scores, axis=-1)
    return jnp.einsum("bhqk,bhkd->bhqd", w.astype(value.dtype), value)


if __name__ == "__main__":
    root = jax.random.PRNGKey(0)
    kq, kk, kv, kq3, kk3, kv3, _ = jax.random.split(root, 7)

    # Small shapes consistent with (batch, num_heads, seq_len, head_dim).
    B, H, S, D = 2, 4, 8, 32
    q = jax.random.normal(kq, (B, H, S, D), dtype=jnp.float32)
    k = jax.random.normal(kk, (B, H, S, D), dtype=jnp.float32)
    v = jax.random.normal(kv, (B, H, S, D), dtype=jnp.float32)
    # 2D padding-style attention mask (batch, seq): last key position masked.
    mask = jnp.ones((B, S), dtype=jnp.int32).at[:, -1].set(0)

    # Case 1: plain attention.
    out1 = scaled_dot_product_attention(q, k, v)
    # Case 2: causal + 2D attention mask.
    out2 = scaled_dot_product_attention(q, k, v, attention_mask=mask,
                                        causal_mask=True)

    # Case 3: multi-tile path (causal DMA clamp + tile skip), lane-dense D=128.
    B3, H3, S3, D3 = 1, 2, 256, 128
    q3 = jax.random.normal(kq3, (B3, H3, S3, D3), dtype=jnp.float32)
    k3 = jax.random.normal(kk3, (B3, H3, S3, D3), dtype=jnp.float32)
    v3 = jax.random.normal(kv3, (B3, H3, S3, D3), dtype=jnp.float32)
    mask3 = jnp.ones((B3, S3), dtype=jnp.int32).at[:, -7:].set(0)
    out3 = scaled_dot_product_attention(q3, k3, v3, attention_mask=mask3,
                                        causal_mask=True,
                                        block_q=128, block_kv=128)

    jax.block_until_ready((out1, out2, out3))

    ref1 = _reference(q, k, v)
    ref2 = _reference(q, k, v, attention_mask=mask, causal_mask=True)
    ref3 = _reference(q3, k3, v3, attention_mask=mask3, causal_mask=True)
    assert jnp.allclose(out1, ref1, atol=2e-3, rtol=2e-3), \
        float(jnp.max(jnp.abs(out1 - ref1)))
    assert jnp.allclose(out2, ref2, atol=2e-3, rtol=2e-3), \
        float(jnp.max(jnp.abs(out2 - ref2)))
    assert jnp.allclose(out3, ref3, atol=2e-3, rtol=2e-3), \
        float(jnp.max(jnp.abs(out3 - ref3)))

    print("KERNEL_OK")
</pallas_src>

<mosaic_0001>
module attributes {stable_mosaic.version = 11 : i64} {
  func.func @_flash_attn_kernel(%arg0: i32, %arg1: i32, %arg2: i32, %arg3: i32, %arg4: memref<1x1x8x32xf32, #tpu.memory_space<vmem>>, %arg5: memref<1x1x8x32xf32, #tpu.memory_space<vmem>>, %arg6: memref<1x1x8x32xf32, #tpu.memory_space<vmem>>, %arg7: memref<1x1x8x32xf32, #tpu.memory_space<vmem>>, %arg8: memref<8x128xf32, #tpu.memory_space<vmem>>, %arg9: memref<8x128xf32, #tpu.memory_space<vmem>>, %arg10: memref<8x32xf32, #tpu.memory_space<vmem>>) attributes {dimension_semantics = [#tpu.dimension_semantics<parallel>, #tpu.dimension_semantics<parallel>, #tpu.dimension_semantics<parallel>, #tpu.dimension_semantics<arbitrary>], iteration_bounds = array<i64: 2, 4, 1, 1>, scalar_prefetch = 0 : i64, scratch_operands = 3 : i64, tpu.core_type = #tpu.core_type<tc>, window_params = [{transform_indices = @transform_0, window_bounds = array<i64: 1, 1, 8, 32>}, {transform_indices = @transform_1, window_bounds = array<i64: 1, 1, 8, 32>}, {transform_indices = @transform_2, window_bounds = array<i64: 1, 1, 8, 32>}, {transform_indices = @transform_3, window_bounds = array<i64: 1, 1, 8, 32>}]} {
    %c0_i32 = arith.constant 0 : i32
    %0 = arith.cmpi eq, %arg3, %c0_i32 : i32
    %1 = arith.extui %0 : i1 to i32
    %c0_i32_0 = arith.constant 0 : i32
    %2 = arith.cmpi ne, %1, %c0_i32_0 : i32
    scf.if %2 {
      %cst_32 = arith.constant 0xFF800000 : f32
      %45 = vector.broadcast %cst_32 : f32 to vector<8x128xf32>
      %c0_33 = arith.constant 0 : index
      %c0_34 = arith.constant 0 : index
      %46 = vector.load %arg8[%c0_33, %c0_34] : memref<8x128xf32, #tpu.memory_space<vmem>>, vector<8x128xf32>
      tpu.vector_store %arg8[%c0_33, %c0_34], %45 {strides = array<i32>} : memref<8x128xf32, #tpu.memory_space<vmem>>, vector<8x128xf32>,
      %cst_35 = arith.constant 0.000000e+00 : f32
      %47 = vector.broadcast %cst_35 : f32 to vector<8x128xf32>
      %c0_36 = arith.constant 0 : index
      %c0_37 = arith.constant 0 : index
      %48 = vector.load %arg9[%c0_36, %c0_37] : memref<8x128xf32, #tpu.memory_space<vmem>>, vector<8x128xf32>
      tpu.vector_store %arg9[%c0_36, %c0_37], %47 {strides = array<i32>} : memref<8x128xf32, #tpu.memory_space<vmem>>, vector<8x128xf32>,
      %cst_38 = arith.constant 0.000000e+00 : f32
      %49 = vector.broadcast %cst_38 : f32 to vector<8x32xf32>
      %c0_39 = arith.constant 0 : index
      %c0_40 = arith.constant 0 : index
      %50 = vector.load %arg10[%c0_39, %c0_40] : memref<8x32xf32, #tpu.memory_space<vmem>>, vector<8x32xf32>
      tpu.vector_store %arg10[%c0_39, %c0_40], %49 {strides = array<i32>} : memref<8x32xf32, #tpu.memory_space<vmem>>, vector<8x32xf32>,
    } else {
    }
    %c0 = arith.constant 0 : index
    %c0_1 = arith.constant 0 : index
    %c0_2 = arith.constant 0 : index
    %c0_3 = arith.constant 0 : index
    %3 = vector.load %arg4[%c0, %c0_1, %c0_2, %c0_3] : memref<1x1x8x32xf32, #tpu.memory_space<vmem>>, vector<1x1x8x32xf32>
    %4 = vector.shape_cast %3 : vector<1x1x8x32xf32> to vector<8x32xf32>
    %cst = arith.constant 0.255034864 : f32
    %5 = vector.broadcast %cst : f32 to vector<8x32xf32>
    %6 = arith.mulf %4, %5 : vector<8x32xf32>
    %c0_4 = arith.constant 0 : index
    %c0_5 = arith.constant 0 : index
    %c0_6 = arith.constant 0 : index
    %c0_7 = arith.constant 0 : index
    %7 = vector.load %arg5[%c0_4, %c0_5, %c0_6, %c0_7] : memref<1x1x8x32xf32, #tpu.memory_space<vmem>>, vector<1x1x8x32xf32>
    %8 = vector.shape_cast %7 : vector<1x1x8x32xf32> to vector<8x32xf32>
    %c0_8 = arith.constant 0 : index
    %c0_9 = arith.constant 0 : index
    %c0_10 = arith.constant 0 : index
    %c0_11 = arith.constant 0 : index
    %9 = vector.load %arg6[%c0_8, %c0_9, %c0_10, %c0_11] : memref<1x1x8x32xf32, #tpu.memory_space<vmem>>, vector<1x1x8x32xf32>
    %10 = vector.shape_cast %9 : vector<1x1x8x32xf32> to vector<8x32xf32>
    %cst_12 = arith.constant dense<0.000000e+00> : vector<8x8xf32>
    %11 = tpu.matmul %6, %8, %cst_12 {dimension_numbers = #tpu.dot_dimension_numbers<[1], [1], [0], [0], [0, 0, 1, 0], [], []>} : vector<8x32xf32>, vector<8x32xf32>, vector<8x8xf32> -> vector<8x8xf32>
    %c0_13 = arith.constant 0 : index
    %c0_14 = arith.constant 0 : index
    %12 = vector.load %arg8[%c0_13, %c0_14] : memref<8x128xf32, #tpu.memory_space<vmem>>, vector<8x128xf32>
    %cst_15 = arith.constant dense<0xFF800000> : vector<8xf32>
    %13 = vector.multi_reduction <maximumf>, %11, %cst_15 [1] : vector<8x8xf32> to vector<8xf32>
    %14 = vector.shape_cast %13 : vector<8xf32> to vector<8x1xf32>
    %15 = vector.broadcast %14 : vector<8x1xf32> to vector<8x128xf32>
    %16 = arith.maximumf %12, %15 : vector<8x128xf32>
    %cst_16 = arith.constant 0xFF800000 : f32
    %17 = vector.broadcast %cst_16 : f32 to vector<8x128xf32>
    %18 = arith.cmpf oeq, %16, %17 : vector<8x128xf32>
    %cst_17 = arith.constant 0.000000e+00 : f32
    %19 = vector.broadcast %cst_17 : f32 to vector<8x128xf32>
    %20 = arith.select %18, %19, %16 : vector<8x128xi1>, vector<8x128xf32>
    %21 = arith.subf %12, %20 : vector<8x128xf32>
    %22 = math.exp2 %21 : vector<8x128xf32>
    %23 = vector.extract_strided_slice %20 {offsets = [0, 0], sizes = [8, 1], strides = [1, 1]} : vector<8x128xf32> to vector<8x1xf32>
    %24 = vector.broadcast %23 : vector<8x1xf32> to vector<8x8xf32>
    %25 = arith.subf %11, %24 : vector<8x8xf32>
    %26 = math.exp2 %25 : vector<8x8xf32>
    %c0_18 = arith.constant 0 : index
    %c0_19 = arith.constant 0 : index
    %27 = vector.load %arg9[%c0_18, %c0_19] : memref<8x128xf32, #tpu.memory_space<vmem>>, vector<8x128xf32>
    %28 = arith.mulf %22, %27 : vector<8x128xf32>
    %cst_20 = arith.constant dense<0.000000e+00> : vector<8xf32>
    %29 = vector.multi_reduction <add>, %26, %cst_20 [1] : vector<8x8xf32> to vector<8xf32>
    %30 = vector.shape_cast %29 : vector<8xf32> to vector<8x1xf32>
    %31 = vector.broadcast %30 : vector<8x1xf32> to vector<8x128xf32>
    %32 = arith.addf %28, %31 : vector<8x128xf32>
    %c0_21 = arith.constant 0 : index
    %c0_22 = arith.constant 0 : index
    %33 = vector.load %arg9[%c0_21, %c0_22] : memref<8x128xf32, #tpu.memory_space<vmem>>, vector<8x128xf32>
    tpu.vector_store %arg9[%c0_21, %c0_22], %32 {strides = array<i32>} : memref<8x128xf32, #tpu.memory_space<vmem>>, vector<8x128xf32>,
    %34 = vector.extract_strided_slice %22 {offsets = [0, 0], sizes = [8, 1], strides = [1, 1]} : vector<8x128xf32> to vector<8x1xf32>
    %c0_23 = arith.constant 0 : index
    %c0_24 = arith.constant 0 : index
    %35 = vector.load %arg10[%c0_23, %c0_24] : memref<8x32xf32, #tpu.memory_space<vmem>>, vector<8x32xf32>
    %36 = vector.broadcast %34 : vector<8x1xf32> to vector<8x32xf32>
    %37 = arith.mulf %36, %35 : vector<8x32xf32>
    %cst_25 = arith.constant dense<0.000000e+00> : vector<8x32xf32>
    %38 = tpu.matmul %26, %10, %cst_25 {dimension_numbers = #tpu.dot_dimension_numbers<[1], [0], [0], [1], [0, 0, 1, 1], [], []>} : vector<8x8xf32>, vector<8x32xf32>, vector<8x32xf32> -> vector<8x32xf32>
    %39 = arith.addf %37, %38 : vector<8x32xf32>
    %c0_26 = arith.constant 0 : index
    %c0_27 = arith.constant 0 : index
    %40 = vector.load %arg10[%c0_26, %c0_27] : memref<8x32xf32, #tpu.memory_space<vmem>>, vector<8x32xf32>
    tpu.vector_store %arg10[%c0_26, %c0_27], %39 {strides = array<i32>} : memref<8x32xf32, #tpu.memory_space<vmem>>, vector<8x32xf32>,
    %c0_28 = arith.constant 0 : index
    %c0_29 = arith.constant 0 : index
    %41 = vector.load %arg8[%c0_28, %c0_29] : memref<8x128xf32, #tpu.memory_space<vmem>>, vector<8x128xf32>
    tpu.vector_store %arg8[%c0_28, %c0_29], %16 {strides = array<i32>} : memref<8x128xf32, #tpu.memory_space<vmem>>, vector<8x128xf32>,
    %c0_i32_30 = arith.constant 0 : i32
    %42 = arith.cmpi eq, %arg3, %c0_i32_30 : i32
    %43 = arith.extui %42 : i1 to i32
    %c0_i32_31 = arith.constant 0 : i32
    %44 = arith.cmpi ne, %43, %c0_i32_31 : i32
    scf.if %44 {
      %c0_32 = arith.constant 0 : index
      %c0_33 = arith.constant 0 : index
      %45 = vector.load %arg9[%c0_32, %c0_33] : memref<8x128xf32, #tpu.memory_space<vmem>>, vector<8x128xf32>
      %cst_34 = arith.constant 1.000000e+00 : f32
      %46 = vector.broadcast %cst_34 : f32 to vector<8x128xf32>
      %47 = arith.divf %46, %45 : vector<8x128xf32>
      %c0_35 = arith.constant 0 : index
      %c0_36 = arith.constant 0 : index
      %48 = vector.load %arg10[%c0_35, %c0_36] : memref<8x32xf32, #tpu.memory_space<vmem>>, vector<8x32xf32>
      %49 = vector.extract_strided_slice %47 {offsets = [0, 0], sizes = [8, 1], strides = [1, 1]} : vector<8x128xf32> to vector<8x1xf32>
      %50 = vector.broadcast %49 : vector<8x1xf32> to vector<8x32xf32>
      %51 = arith.mulf %48, %50 : vector<8x32xf32>
      %c0_37 = arith.constant 0 : index
      %c0_38 = arith.constant 0 : index
      %c0_39 = arith.constant 0 : index
      %c0_40 = arith.constant 0 : index
      %52 = vector.load %arg7[%c0_37, %c0_38, %c0_39, %c0_40] : memref<1x1x8x32xf32, #tpu.memory_space<vmem>>, vector<1x1x8x32xf32>
      %53 = vector.shape_cast %52 : vector<1x1x8x32xf32> to vector<8x32xf32>
      %54 = vector.shape_cast %51 : vector<8x32xf32> to vector<1x1x8x32xf32>
      tpu.vector_store %arg7[%c0_37, %c0_38, %c0_39, %c0_40], %54 {strides = array<i32>} : memref<1x1x8x32xf32, #tpu.memory_space<vmem>>, vector<1x1x8x32xf32>,
    } else {
    }
    return
  }
  func.func @transform_0(%arg0: i32, %arg1: i32, %arg2: i32, %arg3: i32) -> (i32, i32, i32, i32) {
    %c0_i32 = arith.constant 0 : i32
    %c0_i32_0 = arith.constant 0 : i32
    return %arg0, %arg1, %arg2, %c0_i32 : i32, i32, i32, i32
  }
  func.func @transform_1(%arg0: i32, %arg1: i32, %arg2: i32, %arg3: i32) -> (i32, i32, i32, i32) {
    %c0_i32 = arith.constant 0 : i32
    %c0_i32_0 = arith.constant 0 : i32
    return %arg0, %arg1, %arg3, %c0_i32 : i32, i32, i32, i32
  }
  func.func @transform_2(%arg0: i32, %arg1: i32, %arg2: i32, %arg3: i32) -> (i32, i32, i32, i32) {
    %c0_i32 = arith.constant 0 : i32
    %c0_i32_0 = arith.constant 0 : i32
    return %arg0, %arg1, %arg3, %c0_i32 : i32, i32, i32, i32
  }
  func.func @transform_3(%arg0: i32, %arg1: i32, %arg2: i32, %arg3: i32) -> (i32, i32, i32, i32) {
    %c0_i32 = arith.constant 0 : i32
    %c0_i32_0 = arith.constant 0 : i32
    return %arg0, %arg1, %arg2, %c0_i32 : i32, i32, i32, i32
  }
}

</mosaic_0001>

<bundles_post_ra>
// kernel: tpu_custom_call.1
= control target key start
LH: loop header
LB: loop body
LE: loop exit
PB: predicated region body
PF: predicated region fallthrough
CT: control target
= control target key end

     0   :  { %s1127_s0 = inlined_call_operand.hbm [shape: f32[2,4,8,32], index: 0, kind: input, shape index: {}]   ;;  %s1128_s1 = inlined_call_operand.hbm [shape: f32[2,4,8,32], index: 1, kind: input, shape index: {}]   ;;  %s1129_s2 = inlined_call_operand.hbm [shape: f32[2,4,8,32], index: 2, kind: input, shape index: {}]   ;;  %s1130_s3 = inlined_call_operand.hbm [shape: f32[2,4,8,32], index: 3, kind: output, shape index: {}]  }
   0x1   :  { %1136 = sst [smem:[#allocation21_spill]] %s1128_s1 }
   0x2   :  { %8 = vsyncpa [#allocation6], 0 }
   0x3   :  { %10 = vsyncpa [#allocation6 + $0x1], 0 }
   0x4   :  { %11 = vsyncpa [#allocation9], 0 }
   0x5   :  { %13 = vsyncpa [#allocation9 + $0x1], 0 }
   0x6   :  { %14 = vsyncpa [#allocation7], 0 }
   0x7   :  { %16 = vsyncpa [#allocation7 + $0x1], 0  ;;  %s939_s12 = smov 0   ;;  %s941_s13 = smov 0  }
   0x8   :  { %s943_s14 = smov 0   ;;  %s945_s15 = smov 0  }
   0x9   :  { %s947_s16 = smov 0   ;;  %s949_s17 = smov 0  }
   0xa   :  { %s951_s18 = smov 0   ;;  %s953_s19 = smov 0  }
   0xb LB: > { %1137 = sst [smem:[#allocation15_spill]] %s895_s14  ;;  %s980_s20 = sadd.s32 4294967295, %s915_s19   ;;  %s915_s19 = sphi %s953_s19, %s22_s19   ;;  %s911_s18 = sphi %s951_s18, %s1155_s18   ;;  %s907_s17 = sphi %s949_s17, %s1159_s17   ;;  %s903_s16 = sphi %s947_s16, %s1153_s16   ;;  %s899_s15 = sphi %s945_s15, %s1152_s15   ;;  %s895_s14 = sphi %s943_s14, %s1158_s14   ;;  %s891_s13 = sphi %s941_s13, %s1157_s13   ;;  %s887_s12 = sphi %s939_s12, %s1156_s12  }
   0xc   : > { %1138 = sst [smem:[#allocation16_spill]] %s907_s17  ;;  %s599_s21 = sadd.s32 4294967294, %s915_s19  }
   0xd   : > { %1139 = sst [smem:[#allocation17_spill]] %s911_s18  ;;  %s44_s22 = sadd.s32 1, %s907_s17 }
   0xe   : > { %s48_s23 = sadd.s32 1, %s911_s18  ;;  %p46_p0 = scmp.ge.s32.totalorder %s44_s22, 4 }
   0xf   : > { %s59_s24 = sadd.s32 1, %s895_s14  ;;  %p66_p1 = scmp.ne.s32.totalorder %s895_s14, %s891_s13 }
  0x10   : > { %p67_p2 = scmp.eq.s32.totalorder %s915_s19, 0  ;;  %s1161_s22 = smov (%p46_p0, %s44_s22), 0 }
  0x11   : > { %1140 = sst [smem:[#allocation18_spill]] %s1161_s22  ;;  %s1163_s23 = smov (!%p46_p0, %s48_s23), %s911_s18 }
  0x12   : > { %s53_s25 = ssub.s32 %s907_s17, %s1161_s22  ;;  %p994_p3 = por %p67_p2, %p66_p1 }
  0x13   : > { %p50_p4 = scmp.ge.s32.totalorder %s1163_s23, 2  ;;  %p72_p5 = scmp.ne.s32.totalorder %s891_s13, %s887_s12 }
  0x14   : > { %p73_p6 = scmp.eq.s32.totalorder %s980_s20, 0  ;;  %p160_p7 = scmp.eq.s32.totalorder %s980_s20, 7 }
  0x15   : > { %s1165_s23 = smov (%p50_p4, %s1163_s23), 0  ;;  %p166_p10 = scmp.eq.s32.totalorder %s599_s21, 7 }
  0x16   : > { %1142 = sst [smem:[#allocation19_spill]] %s1165_s23  ;;  %p1004_p8 = por %p73_p6, %p72_p5 }
  0x17   : > { %p1008_p9 = por %p160_p7, %p66_p1  ;;  %s52_s29 = ssub.s32 %s911_s18, %s1165_s23 }
  0x18   : > { %s54_s30 = sor.u32 %s53_s25, %s52_s29  ;;  %p1014_p12 = por %p166_p10, %p72_p5 }
  0x19   : > { %p57_p11 = scmp.eq.s32.totalorder %s54_s30, 0  ;;  %p646_p13 = scmp.lt.s32.totalorder %s915_s19, 8 }
  0x1a   : > { %s186_s5 = sand.u32 1, %s895_s14   ;;  %s603_s8 = sshll.u32 %s911_s18, 2 }
  0x1b   : > { %s1021_s6 = scalar_select %p57_p11, %s895_s14, %s59_s24  }
  0x1c   : > { %s602_s7 = sshll.u32 %s186_s5, 3  ;;  %s195_s9 = sadd.s32 %s907_s17, %s603_s8 }
  0x1d   : > { %1146 = sst [smem:[#allocation20_spill]] %s1021_s6  ;;  %p1027_p0 = pnand %p646_p13, %p994_p3 }
  0x1e   : > { %s604_s11 = sshll.u32 %s195_s9, 3  ;;  %s208_s21 = sand.u32 1, %s915_s19  }
  0x1f   : > { %s1148_s1 = sld [smem:[#allocation21_spill]]  ;;  %s212_s22 = scalar_lea.vmem [#allocation8], %s602_s7 }
  0x20   : > { %s223_s24 = sshll.u32 %s212_s22, 4  ;;  %s209_s18 = scalar_lea.sflag [#allocation9], %s208_s21  ;;  %s224_s24 = int_to_ptr.vmem [resolvable:$true] %s223_s24 }
  0x21   : > { %p611_p1 = scmp.ge.s32.totalorder %s915_s19, 1  ;;  %p250_p2 = scmp.lt.s32.totalorder %s915_s19, 9 }
  0x22   : > { %s197_s25 = scalar_lea.hbm %s1127_s0, %s604_s11  ;;  %s187_s22 = scalar_lea.sflag [#allocation6], %s186_s5 }
  0x23   : > { %p1039_p3 = pnand %p611_p1, %p250_p2  ;;  %s199_s29 = sshll.u32 %s197_s25, 4  ;;  %s200_s29 = int_to_ptr.hbm [resolvable:$true] %s199_s29 }
  0x24   : > { %s234_s6 = scalar_lea.vmem [#allocation10], %s602_s7  ;;  %s1056_s8 = sand.u32 (!%p1039_p3), 1, %s891_s13  }
  0x25   : > { %s219_s30 = scalar_lea.hbm %s1148_s1, %s604_s11  ;;  %s245_s14 = sshll.u32 %s234_s6, 4  ;;  %s246_s14 = int_to_ptr.vmem [resolvable:$true] %s245_s14 }
  0x26   : > { %s221_s23 = sshll.u32 %s219_s30, 4  ;;  %s190_s30 = scalar_lea.vmem [#allocation5], %s602_s7  ;;  %s222_s23 = int_to_ptr.hbm [resolvable:$true] %s221_s23 }
  0x27   : > { %638 = dma.hbm_to_vmem [thread:$0]  (!%p1027_p0), %s222_s23, 128, %s224_s24, %s209_s18  }
  0x28   : > { %s201_s1 = sshll.u32 %s190_s30, 4  ;;  %s241_s24 = scalar_lea.hbm %s1129_s2, %s604_s11  ;;  %s202_s1 = int_to_ptr.vmem [resolvable:$true] %s201_s1 }
  0x29   : > { %635 = dma.hbm_to_vmem [thread:$0]  (!%p1027_p0), %s200_s29, 128, %s202_s1, %s187_s22  }
  0x2a   : > { %s243_s17 = sshll.u32 %s241_s24, 4  ;;  %254 = sbr.rel (%p1039_p3) target bundleno = 656 (0x290), region = 32  ;;  %s244_s17 = int_to_ptr.hbm [resolvable:$true] %s243_s17 }
  0x2b   : > { %641 = dma.hbm_to_vmem [thread:$0]  (!%p1027_p0), %s244_s17, 128, %s246_s14, %s209_s18  }
  0x2c   : > { %s1059_s1 = sshll.u32 (!%p1039_p3), %s1056_s8, 3  ;;  %s257_s5 = scalar_lea.sflag (!%p1039_p3), [#allocation6], %s1056_s8 }
  0x2d   : > { %s260_s11 = scalar_lea.vmem (!%p1039_p3), [#allocation5], %s1059_s1 }
  0x2f   : > { %874 = dma.done.wait (%p1004_p8), %s257_s5, 128  }
  0x30   : > { %876 = vsyncadd (%p1004_p8), %s257_s5, 4294967168  ;;  %s266_s14 = sand.u32 1, %s980_s20   ;;  %s270_s18 = scalar_lea.vmem [#allocation8], %s1059_s1 }
  0x31   : > { %s267_s17 = scalar_lea.sflag [#allocation9], %s266_s14 }
  0x32   : > { %878 = dma.done.wait (%p1004_p8), %s267_s17, 256  }
  0x33   : > { %880 = vsyncadd (%p1004_p8), %s267_s17, 4294967040  ;;  %vm320_vm0 = vcmask 261120   ;;  %v917_v0 = vmov 0.0   ;;  %v324_v1 = vld [vmem:[%s270_s18] sm:$0xff]  ;;  %v322_v2 = vld [vmem:[%s260_s11] sm:$0xff]  ;;  %vm354_vm1 = vcmask 64512  }
  0x34   : > { %321 = vst.msk [vmem:[#allocation4] sm:$0xff] %vm320_vm0, %v917_v0  ;;  %616 = vmatpush.xpose.msk.msra.mxu0 %vm320_vm0, %v324_v1  ;;  %v323_v3 = vmul.f32 0.25503486, %v322_v2  ;;  %v918_v6 = vmov 0   ;;  %s280_s20 = scalar_lea.vmem [#allocation10], %s1059_s1  ;;  %s620_s27 = sshll.u32 %s903_s16, 2 }
  0x35   : > { %714 = vset.pattern.permute.xlu0 %v918_v6  ;;  %715 = vset.pattern.permute.xlu1 %v918_v6  ;;  %v325_v9 = vld [vmem:[%s280_s20] sm:$0xff]  ;;  %s449_s6 = sadd.s32 %s899_s15, %s620_s27  ;;  %s313_s25 = scalar_lea.vmem [#allocation11], %s1059_s1 }
  0x36   : > { %716 = vset.pattern.permute.xlu2 %v918_v6  ;;  %402 = vmatpush.msra.mxu1 %v325_v9  ;;  %s621_s7 = sshll.u32 %s449_s6, 3  ;;  %s453_s29 = sshll.u32 %s313_s25, 4  ;;  %s454_s29 = int_to_ptr.vmem [resolvable:$true] %s453_s29 }
  0x37   : > { %617 = vmatmul.msk.f32.vlgmr.msra.gmra.mxu0 %vm320_vm0, %v323_v3  ;;  %s451_s9 = scalar_lea.hbm %s1130_s3, %s621_s7  ;;  %s438_s22 = scalar_lea.sflag [#allocation7], %s1056_s8 }
  0x38   : > { %s455_s30 = sshll.u32 %s451_s9, 4  ;;  %s833_s24 = scalar_lea.hbm %s1130_s3, 64  ;;  %s456_s30 = int_to_ptr.hbm [resolvable:$true] %s455_s30 }
  0x39   : > { %s827_s23 = sshra.s32 %s456_s30, 4  ;;  %s828_s23 = int_to_ptr.hbm [resolvable:$true] %s827_s23 }
  0x3a   : > { %s829_s15 = scalar_lea.hbm %s828_s23, 8  ;;  %p834_p7 = scmp.lt.s32.totalorder %s828_s23, %s1130_s3 }
  0x3b   : > { %v377_v29 = vld [vmem:[#allocation4] sm:$0xff]  ;;  %p830_p4 = scmp.ne.s32.totalorder %s828_s23, %s829_s15  ;;  %p835_p8 = scmp.lt.s32.totalorder %s833_s24, %s829_s15 }
  0x3d   : > { %p831_p5 = pnand %p830_p4, %p1008_p9  ;;  %p836_p10 = por %p835_p8, %p834_p7 }
  0x3f   : > { %p832_p6 = pneg %p831_p5 }
  0x41   : > { %p837_p11 = pnand %p836_p10, %p832_p6 }
  0xb4   : > { %v350_v4 = vpop.f32.mrf.mxu0 }
  0xb5   : > { %v355_v5 = vsel %vm354_vm1, %v350_v4, -inf }
  0xb6   : > { %356 = vmax.xlane.f32.xlu0 %v355_v5 }
 0x129   : > { %v357_v7 = vpop.xlane.xlu0 %356 }
 0x12a   : > { %vm359_vm2 = vcmp.eq.f32.partialorder %v357_v7, -inf }
 0x12b   : > { %v360_v8 = vsel %vm359_vm2, 0.0, %v357_v7 }
 0x12c   : > { %365 = vperm.xlu0 %714, %v360_v8   ;;  %v361_v14 = vsub.f32 -inf, %v360_v8 }
 0x19e   : > { %v366_v10 = vpop.permute.xlu0 %365 }
 0x19f   : > { %v368_v11 = vsub.f32 %v350_v4, %v366_v10 }
 0x1a1   : > { %717 = vpow2.f32 %v368_v11 }
 0x1a2   : > { %719 = vpow2.f32 %v361_v14 }
 0x1a7   : > { %v718_v12 = vpop.eup %717 }
 0x1a8   : > { %618 = vmatmul.msk.f32.vlgmr.msra.gmra.mxu1 %vm354_vm1, %v718_v12  ;;  %v372_v13 = vsel %vm354_vm1, %v718_v12, 0.0  ;;  %v720_v15 = vpop.eup %719 }
 0x1a9   : > { %373 = vadd.xlane.f32.xlu1 %v372_v13  ;;  %v371_v16 = vmul.f32 0.0, %v720_v15 }
 0x1c2   : > { %380 = vperm.xlu1 %715, %v720_v15  }
 0x21c   : > { %v374_v17 = vpop.xlane.xlu1 %373 }
 0x21d   : > { %v375_v18 = vadd.f32 %v374_v17, %v371_v16 }
 0x21f   : > { %721 = vrcp.f32 %v375_v18  ;;  %v425_v22 = vand.u32 2147483648, %v375_v18  ;;  %v423_v24 = vand.u32 2147483647, %v375_v18  ;;  %vm419_vm4 = vweird.f32 %v375_v18 }
 0x221   : > { %v426_v26 = vor.u32 1.1754944e-38, %v425_v22  ;;  %vm424_vm6 = vcmp.eq.f32.partialorder %v423_v24, 8.507059e+37 }
 0x225   : > { %v722_v19 = vpop.eup %721  ;;  %v404_v32 = vpop.f32.mrf.mxu1 }
 0x226   : > { %v415_v20 = vmul.f32 %v722_v19, %v375_v18  ;;  %vm420_vm3 = vweird.f32 %v722_v19 }
 0x227   : > { %vm421_vm5 = vmor %vm419_vm4, %vm420_vm3 }
 0x228   : > { %v416_v21 = vsub.f32 1.0, %v415_v20 }
 0x22a   : > { %v417_v23 = vmul.f32 %v722_v19, %v416_v21 }
 0x22c   : > { %v418_v25 = vadd.f32 %v722_v19, %v417_v23 }
 0x22e   : > { %v422_v27 = vsel %vm421_vm5, %v722_v19, %v418_v25 }
 0x22f   : > { %v427_v28 = vsel %vm424_vm6, %v426_v26, %v422_v27 }
 0x230   : > { %432 = vperm.xlu2 %716, %v427_v28  }
 0x234   : > { %v381_v30 = vpop.permute.xlu1 %380 }
 0x235   : > { %v383_v31 = vmul.f32 %v381_v30, %v377_v29 }
 0x237   : > { %v407_v33 = vadd.f32 %v404_v32, %v383_v31 }
 0x239   : > { %408 = vst.msk [vmem:[#allocation4] sm:$0xff] %vm320_vm0, %v407_v33 }
 0x240   : > { %v429_v35 = vld [vmem:[#allocation4] sm:$0xff] }
 0x28a   : > { %v433_v34 = vpop.permute.xlu2 %432 }
 0x28b   : > { %v435_v36 = vmul.f32 %v433_v34, %v429_v35 }
 0x28d   : > { %436 = vst.msk [vmem:[%s313_s25] sm:$0xff] %vm320_vm0, %v435_v36 }
 0x28e   : > { %840 = shalt.err (!%p837_p11)
}
 0x28f   : > { %630 = dma.vmem_to_hbm [thread:$0]  (%p1008_p9), %s454_s29, 128, %s456_s30, %s438_s22  }
 0x290 PF: > { %p647_p13 = scmp.ge.s32.totalorder %s915_s19, 2  ;;  %s467_s8 = sand.u32 1, %s887_s12  }
 0x291   : > { %s468_s11 = scalar_lea.sflag [#allocation7], %s467_s8 }
 0x292   : > { %p643_p0 = pnand %p647_p13, %p1014_p12 }
 0x294   : > { %p644_p1 = pneg %p643_p0 }
 0x296   : > { %882 = dma.done.wait (%p644_p1), %s468_s11, 128  }
 0x297   : > { %884 = vsyncadd (%p644_p1), %s468_s11, 4294967168  ;;  %s22_s19 = sadd.s32 1, %s915_s19   ;;  %s1150_s14 = sld [smem:[#allocation15_spill]] }
 0x298   : > { %p19_p2 = scmp.ge.s32.totalorder %s22_s19, 10   ;;  %s1151_s17 = sld [smem:[#allocation20_spill]] }
 0x299   : > { %s1152_s15 = sld [smem:[#allocation16_spill]]  ;;  %s1156_s12 = smov %s891_s13 }
 0x29a   : > { %s1153_s16 = sld [smem:[#allocation17_spill]] }
 0x29b   : > { %s1154_s28 = sld [smem:[#allocation18_spill]] }
 0x29c   : > { %s1155_s18 = sld [smem:[#allocation19_spill]] }
 0x29d   : > { %s1157_s13 = smov %s1150_s14  ;;  %21 = sbr.rel (!%p19_p2) target bundleno = 11 (0xb), region = 109 }
 0x29e   : > { %s1158_s14 = smov %s1151_s17 }
 0x2a1   : > { %s1159_s17 = smov %s1154_s28 }
 0x2a2   :  { %474 = vsyncpa [#allocation6], 1 }
 0x2a3   :  { %476 = vsyncpa [#allocation6 + $0x1], 1 }
 0x2a4   :  { %477 = vsyncpa [#allocation9], 1 }
 0x2a5   :  { %479 = vsyncpa [#allocation9 + $0x1], 1 }
 0x2a6   :  { %480 = vsyncpa [#allocation7], 1 }
 0x2a7   :  { %482 = vsyncpa [#allocation7 + $0x1], 1 }

</bundles_post_ra>
